<compile_context>
chip_gen: v7x
topology: tpu7x:2x2x1
jax: 0.10.0
libtpu: 0.0.40
codegen_flags: <defaults>
</compile_context>

<pallas_src>
import functools

import jax
import jax.numpy as jnp
from jax.experimental import pallas as pl
from jax.experimental.pallas import tpu as pltpu


def _round_up(x, m):
    return ((x + m - 1) // m) * m


# ---------------------------------------------------------------------------
# Pallas kernel: one sample per grid step.
#   patches_ref : (HW, KPAD)        bf16   streamed per sample
#   wconv_ref   : (KPAD, CMID_PAD)  bf16   resident
#   bconv_ref   : (1, CMID_PAD)     f32    resident
#   fcw_ref     : (CMID_PAD, OUT_PAD) bf16 resident
#   fcb_ref     : (1, OUT_PAD)      f32    resident
#   out_ref     : (1, 1, OUT_PAD)   f32    per-sample output block
# ---------------------------------------------------------------------------
def _encoder_kernel(patches_ref, wconv_ref, bconv_ref, fcw_ref, fcb_ref,
                    out_ref, *, inv_hw):
    # conv as matmul over im2col patches (bf16 operands, f32 MXU accumulation)
    h = jnp.dot(patches_ref[...], wconv_ref[...],
                preferred_element_type=jnp.float32)            # (HW, CMID_PAD) f32
    # bias + ReLU in f32 on the VPU
    h = jnp.maximum(h + bconv_ref[...], 0.0)
    # global average pool = row reduction (replaces the dense pooling matmul)
    pooled = jnp.sum(h, axis=0, keepdims=True) * inv_hw        # (1, CMID_PAD) f32
    # final linear projection, f32 accumulation + f32 bias
    out = jnp.dot(pooled.astype(jnp.bfloat16), fcw_ref[...],
                  preferred_element_type=jnp.float32) + fcb_ref[...]
    out_ref[...] = out[None]                                   # (1, 1, OUT_PAD)


# ---------------------------------------------------------------------------
# Glue: im2col + padding + pallas_call wrapper
# ---------------------------------------------------------------------------
def _im2col_3x3(x):
    """x: (N, C, H, W) NCHW, zero pad 1 -> patches (N*H*W, C*9)."""
    N, C, H, W = x.shape
    xp = jnp.pad(x, ((0, 0), (0, 0), (1, 1), (1, 1)))
    shifts = [xp[:, :, dy:dy + H, dx:dx + W]
              for dy in range(3) for dx in range(3)]            # 9 x (N, C, H, W)
    p = jnp.stack(shifts, axis=2)                               # (N, C, 9, H, W)
    # -> (N, H, W, C, 9) -> (N*H*W, C*9)  ((C, kh, kw) order matches PyTorch weights)
    return jnp.transpose(p, (0, 3, 4, 1, 2)).reshape(N * H * W, C * 9)


def wrapped_encoder_forward(x, params):
    """x: (N, C, H, W) float32. Returns (N, out_features) float32."""
    N, C, H, W = x.shape
    wconv, bconv, fcw, fcb = params
    cmid = wconv.shape[0]
    out_features = fcw.shape[1]
    hw = H * W
    assert hw % 8 == 0, "H*W must be a multiple of 8 for sublane tiling"

    k = C * 9
    kpad = _round_up(k, 128)
    cmid_pad = _round_up(cmid, 128)
    out_pad = _round_up(out_features, 128)

    # TODO(synk): im2col still materializes a 9x-duplicated patch matrix in HBM;
    # a fully fused version would DMA overlapped image row-tiles and do the 9
    # shifted matmuls in-kernel.  Acceptable at these sizes (and for Cin=4 the
    # padded-K im2col matmul is the better MXU contraction anyway).
    patches = _im2col_3x3(x)
    patches = jnp.pad(patches, ((0, 0), (0, kpad - k))).astype(jnp.bfloat16)

    wconv_mat = wconv.reshape(cmid, k).T                                    # (k, cmid)
    wconv_mat = jnp.pad(wconv_mat,
                        ((0, kpad - k), (0, cmid_pad - cmid))).astype(jnp.bfloat16)
    bconv_row = jnp.pad(bconv.reshape(1, cmid),
                        ((0, 0), (0, cmid_pad - cmid))).astype(jnp.float32)
    fcw_mat = jnp.pad(fcw, ((0, cmid_pad - cmid),
                            (0, out_pad - out_features))).astype(jnp.bfloat16)
    fcb_row = jnp.pad(fcb.reshape(1, out_features),
                      ((0, 0), (0, out_pad - out_features))).astype(jnp.float32)

    kernel = functools.partial(_encoder_kernel, inv_hw=1.0 / hw)

    bytes_accessed = (patches.size * 2 + wconv_mat.size * 2 + fcw_mat.size * 2
                      + bconv_row.size * 4 + fcb_row.size * 4 + N * out_pad * 4)
    cost = pl.CostEstimate(
        flops=2 * N * hw * kpad * cmid_pad + 2 * N * cmid_pad * out_pad,
        transcendentals=0,
        bytes_accessed=bytes_accessed)

    out = pl.pallas_call(
        kernel,
        out_shape=jax.ShapeDtypeStruct((N, 1, out_pad), jnp.float32),
        grid_spec=pltpu.PrefetchScalarGridSpec(
            num_scalar_prefetch=0,
            grid=(N,),
            in_specs=[
                # streamed per-sample patch tile (double-buffered by the pipeline)
                pl.BlockSpec((hw, kpad), lambda i: (i, 0)),
                # weights / biases: constant block index -> resident, no re-DMA
                pl.BlockSpec((kpad, cmid_pad), lambda i: (0, 0)),
                pl.BlockSpec((1, cmid_pad), lambda i: (0, 0)),
                pl.BlockSpec((cmid_pad, out_pad), lambda i: (0, 0)),
                pl.BlockSpec((1, out_pad), lambda i: (0, 0)),
            ],
            out_specs=pl.BlockSpec((1, 1, out_pad), lambda i: (i, 0, 0)),
        ),
        compiler_params=pltpu.CompilerParams(
            dimension_semantics=("parallel",),        # samples shard across TCs (v7x)
            vmem_limit_bytes=32 << 20),               # footprint << 1 MiB; v7x-safe
        cost_estimate=cost,
    )(patches, wconv_mat, bconv_row, fcw_mat, fcb_row)

    return out.reshape(N, out_pad)[:, :out_features]


# ---------------------------------------------------------------------------
# Deterministic parameter initialization (synthetic encoder)
# ---------------------------------------------------------------------------
def init_params(key, c_in, c_mid, out_features):
    k1, k2, k3, k4 = jax.random.split(key, 4)
    wconv = 0.1 * jax.random.normal(k1, (c_mid, c_in, 3, 3), jnp.float32)
    bconv = 0.1 * jax.random.normal(k2, (c_mid,), jnp.float32)
    fcw = 0.1 * jax.random.normal(k3, (c_mid, out_features), jnp.float32)
    fcb = 0.1 * jax.random.normal(k4, (out_features,), jnp.float32)
    return wconv, bconv, fcw, fcb


if __name__ == "__main__":
    key = jax.random.PRNGKey(0)
    kx, kp = jax.random.split(key)

    N, C, H, W = 2, 4, 16, 16
    C_MID, OUT_FEATURES = 32, 32

    x = jax.random.normal(kx, (N, C, H, W), jnp.float32)
    params = init_params(kp, C, C_MID, OUT_FEATURES)

    y = wrapped_encoder_forward(x, params)
    jax.block_until_ready(y)
    assert y.shape == (N, OUT_FEATURES)
    print("KERNEL_OK")
</pallas_src>

<mosaic_0001>
module attributes {stable_mosaic.version = 11 : i64} {
  func.func @_encoder_kernel(%arg0: i32, %arg1: memref<256x128xbf16, #tpu.memory_space<vmem>>, %arg2: memref<128x128xbf16, #tpu.memory_space<vmem>>, %arg3: memref<1x128xf32, #tpu.memory_space<vmem>>, %arg4: memref<128x128xbf16, #tpu.memory_space<vmem>>, %arg5: memref<1x128xf32, #tpu.memory_space<vmem>>, %arg6: memref<1x1x128xf32, #tpu.memory_space<vmem>>) attributes {dimension_semantics = [#tpu.dimension_semantics<parallel>], iteration_bounds = array<i64: 2>, scalar_prefetch = 0 : i64, scratch_operands = 0 : i64, tpu.core_type = #tpu.core_type<tc>, window_params = [{transform_indices = @transform_0, window_bounds = array<i64: 256, 128>}, {pipeline_mode = #tpu.pipeline_mode<synchronous>, transform_indices = @transform_1, window_bounds = array<i64: 128, 128>}, {pipeline_mode = #tpu.pipeline_mode<synchronous>, transform_indices = @transform_2, window_bounds = array<i64: 1, 128>}, {pipeline_mode = #tpu.pipeline_mode<synchronous>, transform_indices = @transform_3, window_bounds = array<i64: 128, 128>}, {pipeline_mode = #tpu.pipeline_mode<synchronous>, transform_indices = @transform_4, window_bounds = array<i64: 1, 128>}, {transform_indices = @transform_5, window_bounds = array<i64: 1, 1, 128>}]} {
    %c0 = arith.constant 0 : index
    %c0_0 = arith.constant 0 : index
    %0 = vector.load %arg1[%c0, %c0_0] : memref<256x128xbf16, #tpu.memory_space<vmem>>, vector<256x128xbf16>
    %c0_1 = arith.constant 0 : index
    %c0_2 = arith.constant 0 : index
    %1 = vector.load %arg2[%c0_1, %c0_2] : memref<128x128xbf16, #tpu.memory_space<vmem>>, vector<128x128xbf16>
    %cst = arith.constant dense<0.000000e+00> : vector<256x128xf32>
    %2 = tpu.matmul %0, %1, %cst {dimension_numbers = #tpu.dot_dimension_numbers<[1], [0], [0], [1], [0, 0, 1, 1], [], []>} : vector<256x128xbf16>, vector<128x128xbf16>, vector<256x128xf32> -> vector<256x128xf32>
    %c0_3 = arith.constant 0 : index
    %c0_4 = arith.constant 0 : index
    %3 = vector.load %arg3[%c0_3, %c0_4] : memref<1x128xf32, #tpu.memory_space<vmem>>, vector<1x128xf32>
    %4 = vector.broadcast %3 : vector<1x128xf32> to vector<256x128xf32>
    %5 = arith.addf %2, %4 : vector<256x128xf32>
    %cst_5 = arith.constant 0.000000e+00 : f32
    %6 = vector.broadcast %cst_5 : f32 to vector<256x128xf32>
    %7 = arith.maximumf %5, %6 : vector<256x128xf32>
    %cst_6 = arith.constant dense<0.000000e+00> : vector<128xf32>
    %8 = vector.multi_reduction <add>, %7, %cst_6 [0] : vector<256x128xf32> to vector<128xf32>
    %9 = vector.shape_cast %8 : vector<128xf32> to vector<1x128xf32>
    %cst_7 = arith.constant 3.906250e-03 : f32
    %10 = vector.broadcast %cst_7 : f32 to vector<1x128xf32>
    %11 = arith.mulf %9, %10 : vector<1x128xf32>
    %12 = arith.truncf %11 : vector<1x128xf32> to vector<1x128xbf16>
    %c0_8 = arith.constant 0 : index
    %c0_9 = arith.constant 0 : index
    %13 = vector.load %arg4[%c0_8, %c0_9] : memref<128x128xbf16, #tpu.memory_space<vmem>>, vector<128x128xbf16>
    %cst_10 = arith.constant dense<0.000000e+00> : vector<1x128xf32>
    %14 = tpu.matmul %12, %13, %cst_10 {dimension_numbers = #tpu.dot_dimension_numbers<[1], [0], [0], [1], [0, 0, 1, 1], [], []>} : vector<1x128xbf16>, vector<128x128xbf16>, vector<1x128xf32> -> vector<1x128xf32>
    %c0_11 = arith.constant 0 : index
    %c0_12 = arith.constant 0 : index
    %15 = vector.load %arg5[%c0_11, %c0_12] : memref<1x128xf32, #tpu.memory_space<vmem>>, vector<1x128xf32>
    %16 = arith.addf %14, %15 : vector<1x128xf32>
    %17 = vector.shape_cast %16 : vector<1x128xf32> to vector<1x1x128xf32>
    %c0_13 = arith.constant 0 : index
    %c0_14 = arith.constant 0 : index
    %c0_15 = arith.constant 0 : index
    %18 = vector.load %arg6[%c0_13, %c0_14, %c0_15] : memref<1x1x128xf32, #tpu.memory_space<vmem>>, vector<1x1x128xf32>
    tpu.vector_store %arg6[%c0_13, %c0_14, %c0_15], %17 {strides = array<i32>} : memref<1x1x128xf32, #tpu.memory_space<vmem>>, vector<1x1x128xf32>,
    return
  }
  func.func @transform_0(%arg0: i32) -> (i32, i32) {
    %c0_i32 = arith.constant 0 : i32
    %c0_i32_0 = arith.constant 0 : i32
    return %arg0, %c0_i32 : i32, i32
  }
  func.func @transform_1(%arg0: i32) -> (i32, i32) {
    %c0_i32 = arith.constant 0 : i32
    %c0_i32_0 = arith.constant 0 : i32
    %c0_i32_1 = arith.constant 0 : i32
    return %c0_i32, %c0_i32_0 : i32, i32
  }
  func.func @transform_2(%arg0: i32) -> (i32, i32) {
    %c0_i32 = arith.constant 0 : i32
    %c0_i32_0 = arith.constant 0 : i32
    %c0_i32_1 = arith.constant 0 : i32
    return %c0_i32, %c0_i32_0 : i32, i32
  }
  func.func @transform_3(%arg0: i32) -> (i32, i32) {
    %c0_i32 = arith.constant 0 : i32
    %c0_i32_0 = arith.constant 0 : i32
    %c0_i32_1 = arith.constant 0 : i32
    return %c0_i32, %c0_i32_0 : i32, i32
  }
  func.func @transform_4(%arg0: i32) -> (i32, i32) {
    %c0_i32 = arith.constant 0 : i32
    %c0_i32_0 = arith.constant 0 : i32
    %c0_i32_1 = arith.constant 0 : i32
    return %c0_i32, %c0_i32_0 : i32, i32
  }
  func.func @transform_5(%arg0: i32) -> (i32, i32, i32) {
    %c0_i32 = arith.constant 0 : i32
    %c0_i32_0 = arith.constant 0 : i32
    %c0_i32_1 = arith.constant 0 : i32
    return %arg0, %c0_i32, %c0_i32_0 : i32, i32, i32
  }
}

</mosaic_0001>

<bundles_post_ra>
// kernel: tpu_custom_call.1
= control target key start
LH: loop header
LB: loop body
LE: loop exit
PB: predicated region body
PF: predicated region fallthrough
CT: control target
= control target key end

     0   :  { %10 = vsyncpa [#allocation3], 0  ;;  %s1657_s0 = inlined_call_operand.hbm [shape: bf16[512,128], index: 0, kind: input, shape index: {}]   ;;  %s1658_s1 = inlined_call_operand.hbm [shape: bf16[128,128], index: 1, kind: input, shape index: {}]   ;;  %s1659_s2 = inlined_call_operand.vmem [shape: f32[1,128], index: 2, kind: input, shape index: {}]   ;;  %s1660_s3 = inlined_call_operand.hbm [shape: bf16[128,128], index: 3, kind: input, shape index: {}]   ;;  %s1661_s4 = inlined_call_operand.vmem [shape: f32[1,128], index: 4, kind: input, shape index: {}]   ;;  %s1662_s5 = inlined_call_operand.hbm [shape: f32[2,1,128], index: 5, kind: output, shape index: {}]  }
   0x1   :  { %12 = vsyncpa [#allocation3 + $0x1], 0 }
   0x2   :  { %13 = vsyncpa [#allocation6], 0 }
   0x3   :  { %14 = vsyncpa [#allocation4], 0 }
   0x4   :  { %16 = vsyncpa [#allocation4 + $0x1], 0  ;;  %s1357_s18 = smov 0   ;;  %s1359_s19 = smov 0  }
   0x5   :  { %s1361_s20 = smov 0   ;;  %s1363_s21 = smov 0  }
   0x6 LB: > { %s1378_s22 = sadd.s32 4294967295, %s1317_s21   ;;  %s908_s23 = sadd.s32 4294967294, %s1317_s21   ;;  %s1317_s21 = sphi %s1363_s21, %s1682_s21   ;;  %s1313_s20 = sphi %s1361_s20, %s1681_s20   ;;  %s1309_s19 = sphi %s1359_s19, %s1680_s19   ;;  %s1305_s18 = sphi %s1357_s18, %s1679_s18  }
   0x7   : > { %p42_p0 = scmp.ne.s32.totalorder %s1309_s19, %s1305_s18  ;;  %p1663_p1 = scmp.eq.s32.totalorder %s1378_s22, 0 }
   0x8   : > { %p156_p3 = scmp.eq.s32.totalorder %s908_s23, 1  ;;  %p909_p5 = scmp.ge.s32.totalorder %s1317_s21, 1 }
   0x9   : > { %p1387_p4 = por %p1663_p1, %p42_p0  ;;  %p163_p7 = scmp.lt.s32.totalorder %s1317_s21, 3 }
   0xa   : > { %p1392_p6 = por %p156_p3, %p42_p0  ;;  %s1319_s27 = smov [#allocation5]  }
   0xb   : > { %s1666_s24 = scalar_select %p1387_p4, 1, 0 }
   0xc   : > { %s1667_s25 = scalar_select %p1392_p6, 1, 0 }
   0xd   : > { %p1397_p8 = pnand %p909_p5, %p163_p7  ;;  %s175_s28 = sshll.u32 %s1319_s27, 4  ;;  %s1401_s28 = int_to_ptr.vmem [resolvable:$true] %s175_s28 }
   0xe   : > { %s1320_s30 = smov [#allocation7]   ;;  %s1161_s9 = scalar_lea.hbm %s1658_s1, 1024 }
   0xf   : > { %p1070_p9 = pneg %p1397_p8  ;;  %s191_s6 = sshll.u32 %s1320_s30, 4  ;;  %s1412_s6 = int_to_ptr.vmem [resolvable:$true] %s191_s6 }
  0x10   : > { %p1162_p12 = scmp.ne.s32.totalorder %s1658_s1, %s1161_s9  ;;  %p1168_p5 = scmp.lt.u32.totalorder %s1161_s9, %s1658_s1 }
  0x11   : > { %p1408_p11 = pnand %p1070_p9, %p1663_p1 }
  0x13   : > { %p1163_p13 = pneg %p1408_p11 }
  0x15   : > { %p1164_p0 = pnand %p1163_p13, %p1162_p12 }
  0x17   : > { %p1165_p3 = pneg %p1164_p0 }
  0x19   : > { %p1170_p7 = pnand %p1168_p5, %p1165_p3 }
  0x1b   : > { %1173 = shalt.err (!%p1170_p7)
}
  0x1c   : > { %s1174_s14 = scalar_lea.vmem %s1401_s28, 1024  ;;  %p1182_p2 = scmp.lt.s32.totalorder %s1401_s28, %s1401_s28 }
  0x1d   : > { %p1175_p9 = scmp.ne.s32.totalorder %s1401_s28, %s1174_s14  ;;  %p1183_p12 = scmp.lt.s32.totalorder %s1174_s14, %s1174_s14 }
  0x1f   : > { %p1177_p10 = pnand %p1175_p9, %p1163_p13  ;;  %p1184_p0 = por %p1183_p12, %p1182_p2 }
  0x21   : > { %p1178_p1 = pneg %p1177_p10 }
  0x23   : > { %p1185_p6 = pnand %p1184_p0, %p1178_p1 }
  0x25   : > { %1188 = shalt.err (!%p1185_p6)
}
  0x26   : > { %s1321_s15 = smov 64   ;;  %s1322_s16 = smov 4  }
  0x27   : > { %1073 = dma.hbm_to_vmem [thread:$0]  (!%p1408_p11), %s1658_s1, 1024, %s1401_s28, [#allocation6], %s1321_s15, %s1321_s15, %s1322_s16  }
  0x28   : > { %s1189_s7 = scalar_lea.hbm %s1660_s3, 1024 }
  0x29   : > { %p1190_p1 = scmp.ne.s32.totalorder %s1660_s3, %s1189_s7  ;;  %p1196_p10 = scmp.lt.u32.totalorder %s1189_s7, %s1660_s3 }
  0x2b   : > { %p1192_p2 = pnand %p1190_p1, %p1163_p13 }
  0x2d   : > { %p1193_p6 = pneg %p1192_p2 }
  0x2f   : > { %p1198_p3 = pnand %p1196_p10, %p1193_p6 }
  0x31   : > { %1201 = shalt.err (!%p1198_p3)
}
  0x32   : > { %s1202_s28 = scalar_lea.vmem %s1412_s6, 1024  ;;  %p1210_p12 = scmp.lt.s32.totalorder %s1412_s6, %s1412_s6 }
  0x33   : > { %p1203_p5 = scmp.ne.s32.totalorder %s1412_s6, %s1202_s28  ;;  %p1211_p0 = scmp.lt.s32.totalorder %s1202_s28, %s1202_s28 }
  0x35   : > { %p1205_p7 = pnand %p1203_p5, %p1163_p13  ;;  %p1212_p1 = por %p1211_p0, %p1210_p12 }
  0x37   : > { %p1206_p9 = pneg %p1205_p7 }
  0x39   : > { %p1213_p2 = pnand %p1212_p1, %p1206_p9 }
  0x3b   : > { %1216 = shalt.err (!%p1213_p2)
}
  0x3c   : > { %1076 = dma.hbm_to_vmem [thread:$0]  (!%p1408_p11), %s1660_s3, 1024, %s1412_s6, [#allocation6], %s1321_s15, %s1321_s15, %s1322_s16  }
  0x3d   : > { %s1473_s29 = sadd.s32 1, %s1317_s21   ;;  %s29_s14 = sadd.s32 1, %s1313_s20 }
  0x3e   : > { %s26_s17 = ssub.s32 %s1317_s21, %s1473_s29  ;;  %p36_p13 = scmp.ne.s32.totalorder %s1313_s20, %s1309_s19 }
  0x3f   : > { %p27_p6 = scmp.eq.s32.totalorder %s26_s17, 0  ;;  %p37_p10 = scmp.eq.s32.totalorder %s1317_s21, 0 }
  0x40   : > { %p1670_p3 = scmp.eq.s32.totalorder %s1378_s22, 1  ;;  %p1087_p7 = scmp.lt.s32.totalorder %s1317_s21, 2 }
  0x41   : > { %s1489_s27 = scalar_select %p27_p6, %s1313_s20, %s29_s14  }
  0x42   : > { %p1483_p5 = por %p1670_p3, %p36_p13  ;;  %p38_p9 = por %p37_p10, %p36_p13 }
  0x43   : > { %s208_s30 = sand.u32 1, %s1313_s20   ;;  %s956_s6 = sshll.u32 %s1317_s21, 11 }
  0x44   : > { %s1671_s23 = scalar_select %p1483_p5, 1, 0 }
  0x45   : > { %s913_s7 = sshll.u32 %s208_s30, 7  ;;  %s1496_s10 = scalar_lea.hbm %s1657_s0, %s956_s6 }
  0x46   : > { %s212_s11 = scalar_lea.vmem [#allocation2], %s913_s7  ;;  %p1500_p11 = pnand %p1087_p7, %p38_p9 }
  0x47   : > { %s219_s28 = sshll.u32 %s212_s11, 4  ;;  %s1504_s13 = scalar_lea.sflag [#allocation3], %s208_s30  ;;  %s1498_s28 = int_to_ptr.vmem [resolvable:$true] %s219_s28 }
  0x48   : > { %s1217_s14 = scalar_lea.hbm %s1496_s10, 2048  ;;  %p1219_p0 = pneg %p1500_p11 }
  0x49   : > { %p1218_p12 = scmp.ne.s32.totalorder %s1496_s10, %s1217_s14  ;;  %s1222_s6 = scalar_lea.hbm %s1657_s0, 4096 }
  0x4a   : > { %p1223_p13 = scmp.lt.u32.totalorder %s1496_s10, %s1657_s0  ;;  %p1224_p6 = scmp.lt.u32.totalorder %s1222_s6, %s1217_s14 }
  0x4b   : > { %p1220_p1 = pnand %p1219_p0, %p1218_p12  ;;  %p1226_p3 = scmp.lt.u32.totalorder %s1217_s14, %s1496_s10 }
  0x4c   : > { %p1225_p10 = por %p1224_p6, %p1223_p13 }
  0x4d   : > { %p1221_p2 = pneg %p1220_p1 }
  0x4e   : > { %p1227_p7 = por %p1226_p3, %p1225_p10 }
  0x50   : > { %p1228_p9 = pnand %p1227_p7, %p1221_p2 }
  0x52   : > { %1231 = shalt.err (!%p1228_p9)
}
  0x53   : > { %s1232_s30 = scalar_lea.vmem %s1498_s28, 2048  ;;  %s1323_s11 = smov [#allocation2]  }
  0x54   : > { %p1233_p12 = scmp.ne.s32.totalorder %s1498_s28, %s1232_s30  ;;  %s1237_s17 = sshll.u32 %s1323_s11, 4  ;;  %s1238_s17 = int_to_ptr.vmem [resolvable:$false] %s1237_s17 }
  0x55   : > { %s1239_s7 = scalar_lea.vmem %s1238_s17, 4096  ;;  %p1240_p4 = scmp.lt.s32.totalorder %s1498_s28, %s1238_s17 }
  0x56   : > { %p1235_p1 = pnand %p1233_p12, %p1219_p0  ;;  %p1241_p13 = scmp.lt.s32.totalorder %s1239_s7, %s1232_s30 }
  0x58   : > { %p1236_p5 = pneg %p1235_p1  ;;  %p1242_p6 = por %p1241_p13, %p1240_p4 }
  0x5a   : > { %p1243_p10 = pnand %p1242_p6, %p1236_p5 }
  0x5c   : > { %1246 = shalt.err (!%p1243_p10)
}
  0x5d   : > { %1080 = dma.hbm_to_vmem [thread:$0]  (!%p1500_p11), %s1496_s10, 2048, %s1498_s28, %s1504_s13, %s1321_s15, %s1321_s15, %s1322_s16  }
  0x5e   : > { %231 = sbr.rel (%p1397_p8) target bundleno = 663 (0x297), region = 40  ;;  %s1538_s14 = sand.u32 (!%p1397_p8), 1, %s1309_s19  }
  0x5f   : > { %s917_s6 = sshll.u32 (!%p1397_p8), %s1538_s14, 7  ;;  %s234_s8 = scalar_lea.sflag (!%p1397_p8), [#allocation3], %s1538_s14 }
  0x60   : > { %s1542_s9 = scalar_lea.vmem (!%p1397_p8), [#allocation2], %s917_s6  ;;  %p1673_p4 = scmp.ne.s32.totalorder (!%p1397_p8), %s1666_s24, 0 }
  0x65   : > { %1292 = dma.done.wait (%p1673_p4), %s234_s8, 2048  }
  0x66   : > { %1294 = vsyncadd (%p1673_p4), %s234_s8, 4294965248  ;;  %p1674_p5 = scmp.eq.s32.totalorder %s1378_s22, 0 }
  0x68   : > { %1296 = dma.done.wait (%p1674_p5), [#allocation6], 2048   ;;  %p1675_p8 = pmov %p1674_p5 }
  0x69   : > { %v1129_v0 = vld [vmem:[#allocation5] sm:$0xff]   ;;  %v1130_v1 = vld [vmem:[#allocation5 + $0x8] sm:$0xff]   ;;  %v1131_v2 = vld [vmem:[#allocation5 + $0x10] sm:$0xff]   ;;  %v1324_v25 = vmov 0.0   ;;  %vm1325_vm0 = vmmov 0   ;;  %s953_s10 = sshll.u32 %s1378_s22, 4 }
  0x6a   : > { %1298 = vsyncadd (%p1675_p8), [#allocation6], 4294965248  ;;  %990 = vmatprep.subr.bf16.mxu0 %v1129_v0  ;;  %v1132_v3 = vld [vmem:[#allocation5 + $0x18] sm:$0xff]   ;;  %v1137_v4 = vld [vmem:[%s1542_s9] sm:$0xff]   ;;  %1038 = vmatprep.subr.bf16.mxu1 %v1324_v25  ;;  %s270_s28 = scalar_lea.vmem [#allocation8], %s1538_s14  ;;  %s1613_s11 = scalar_lea.hbm %s1662_s5, %s953_s10 }
  0x6b   : > { %991 = vmatpush3.bf16.msra.mxu0 %v1129_v0  ;;  %1006 = vmatprep.mubr.bf16.mxu0 %v1137_v4  ;;  %v1133_v5 = vld [vmem:[#allocation5 + $0x20] sm:$0xff]   ;;  %v1134_v6 = vld [vmem:[#allocation5 + $0x28] sm:$0xff]   ;;  %v1135_v7 = vld [vmem:[#allocation5 + $0x30] sm:$0xff]   ;;  %s823_s12 = sshll.u32 %s270_s28, 4  ;;  %s811_s17 = scalar_lea.sflag [#allocation4], %s1538_s14  ;;  %s1615_s12 = int_to_ptr.vmem [resolvable:$true] %s823_s12 }
  0x6c   : > { %992 = vmatprep.subr.bf16.mxu0 %v1130_v1  ;;  %v1136_v8 = vld [vmem:[#allocation5 + $0x38] sm:$0xff]   ;;  %v1138_v9 = vld [vmem:[%s1542_s9 + $0x8] sm:$0xff]   ;;  %v1139_v10 = vld [vmem:[%s1542_s9 + $0x10] sm:$0xff]   ;;  %1054 = vmatprep.mubr.msk.bf16.mxu1 %vm1325_vm0, %v1324_v25  ;;  %s1247_s22 = scalar_lea.vmem %s1615_s12, 16  ;;  %p1676_p0 = scmp.ne.s32.totalorder %s1671_s23, 0 }
  0x6d   : > { %v1140_v11 = vld [vmem:[%s1542_s9 + $0x18] sm:$0xff]   ;;  %v1141_v12 = vld [vmem:[%s1542_s9 + $0x20] sm:$0xff]   ;;  %v1142_v13 = vld [vmem:[%s1542_s9 + $0x28] sm:$0xff]   ;;  %p1248_p11 = scmp.ne.s32.totalorder %s1615_s12, %s1247_s22  ;;  %s1326_s7 = smov [#allocation8]  }
  0x6e   : > { %v1143_v14 = vld [vmem:[%s1542_s9 + $0x30] sm:$0xff]   ;;  %v1144_v15 = vld [vmem:[%s1542_s9 + $0x38] sm:$0xff]   ;;  %v1145_v16 = vld [vmem:[%s1542_s9 + $0x40] sm:$0xff]   ;;  %s1251_s6 = sshll.u32 %s1326_s7, 4  ;;  %s1252_s6 = int_to_ptr.vmem [resolvable:$false] %s1251_s6 }
  0x6f   : > { %993 = vmatpush3.bf16.msra.mxu0 %v1130_v1  ;;  %v1146_v17 = vld [vmem:[%s1542_s9 + $0x48] sm:$0xff]   ;;  %v1147_v18 = vld [vmem:[%s1542_s9 + $0x50] sm:$0xff]   ;;  %v1148_v19 = vld [vmem:[%s1542_s9 + $0x58] sm:$0xff]   ;;  %p1249_p2 = pnand %p1248_p11, %p1676_p0  ;;  %s1253_s8 = scalar_lea.vmem %s1252_s6, 32 }
  0x70   : > { %994 = vmatprep.subr.bf16.mxu0 %v1131_v2  ;;  %v1149_v20 = vld [vmem:[%s1542_s9 + $0x60] sm:$0xff]   ;;  %v1150_v21 = vld [vmem:[%s1542_s9 + $0x68] sm:$0xff]   ;;  %v1151_v22 = vld [vmem:[%s1542_s9 + $0x70] sm:$0xff]   ;;  %p1254_p7 = scmp.lt.s32.totalorder %s1615_s12, %s1252_s6  ;;  %p1255_p9 = scmp.lt.s32.totalorder %s1253_s8, %s1247_s22 }
  0x71   : > { %v1152_v23 = vld [vmem:[%s1542_s9 + $0x78] sm:$0xff]   ;;  %v1153_v24 = vld [vmem:[#allocation7] sm:$0xff]   ;;  %v1154_v26 = vld [vmem:[#allocation7 + $0x8] sm:$0xff]   ;;  %p1250_p3 = pneg %p1249_p2 }
  0x72   : > { %1039 = vmatpush3.bf16.msra.mxu1 %v1153_v24  ;;  %v1155_v27 = vld [vmem:[#allocation7 + $0x10] sm:$0xff]   ;;  %v1156_v28 = vld [vmem:[#allocation7 + $0x18] sm:$0xff]   ;;  %v1157_v29 = vld [vmem:[#allocation7 + $0x20] sm:$0xff]   ;;  %p1256_p12 = por %p1255_p9, %p1254_p7 }
  0x73   : > { %995 = vmatpush3.bf16.msra.mxu0 %v1131_v2  ;;  %1040 = vmatprep.subr.bf16.mxu1 %v1324_v25  ;;  %v1158_v30 = vld [vmem:[#allocation7 + $0x28] sm:$0xff]   ;;  %v1159_v31 = vld [vmem:[#allocation7 + $0x30] sm:$0xff]   ;;  %v1160_v32 = vld [vmem:[#allocation7 + $0x38] sm:$0xff]  }
  0x74   : > { %996 = vmatprep.subr.bf16.mxu0 %v1132_v3  ;;  %v1571_v33 = vld [vmem:[%s1659_s2] ss:$0 sm:$0xff]  ;;  %p1257_p1 = pnand %p1256_p12, %p1250_p3 }
  0x76   : > { %1041 = vmatpush3.bf16.msra.mxu1 %v1154_v26 }
  0x77   : > { %997 = vmatpush3.bf16.msra.mxu0 %v1132_v3  ;;  %1042 = vmatprep.subr.bf16.mxu1 %v1324_v25 }
  0x78   : > { %998 = vmatprep.subr.bf16.mxu0 %v1133_v5 }
  0x7a   : > { %1043 = vmatpush3.bf16.msra.mxu1 %v1155_v27 }
  0x7b   : > { %999 = vmatpush3.bf16.msra.mxu0 %v1133_v5  ;;  %1044 = vmatprep.subr.bf16.mxu1 %v1324_v25 }
  0x7c   : > { %1000 = vmatprep.subr.bf16.mxu0 %v1134_v6 }
  0x7e   : > { %1045 = vmatpush3.bf16.msra.mxu1 %v1156_v28 }
  0x7f   : > { %1001 = vmatpush3.bf16.msra.mxu0 %v1134_v6  ;;  %1046 = vmatprep.subr.bf16.mxu1 %v1324_v25 }
  0x80   : > { %1002 = vmatprep.subr.bf16.mxu0 %v1135_v7 }
  0x82   : > { %1047 = vmatpush3.bf16.msra.mxu1 %v1157_v29 }
  0x83   : > { %1003 = vmatpush3.bf16.msra.mxu0 %v1135_v7  ;;  %1048 = vmatprep.subr.bf16.mxu1 %v1324_v25 }
  0x84   : > { %1004 = vmatprep.subr.bf16.mxu0 %v1136_v8 }
  0x86   : > { %1049 = vmatpush3.bf16.msra.mxu1 %v1158_v30 }
  0x87   : > { %1005 = vmatpush3.bf16.msra.mxu0 %v1136_v8  ;;  %1050 = vmatprep.subr.bf16.mxu1 %v1324_v25 }
  0x8a   : > { %1007 = vmatmul.mubr.bf16.vlgmr.msra.gmra.mrb[0].mxu0 %v1138_v9  ;;  %1051 = vmatpush3.bf16.msra.mxu1 %v1159_v31 }
  0x8b   : > { %1010 = vmatprep.mubr.bf16.mxu0 %v1139_v10  ;;  %1052 = vmatprep.subr.bf16.mxu1 %v1324_v25 }
  0x8e   : > { %1053 = vmatpush3.bf16.msra.mxu1 %v1160_v32 }
  0x92   : > { %1011 = vmatmul.mubr.bf16.gmra.mrb[4].mxu0 %v1140_v11 }
  0x93   : > { %1014 = vmatprep.mubr.bf16.mxu0 %v1141_v12 }
  0x9a   : > { %1015 = vmatmul.mubr.bf16.gmra.mrb[8].mxu0 %v1142_v13 }
  0x9b   : > { %1018 = vmatprep.mubr.bf16.mxu0 %v1143_v14 }
  0xa2   : > { %1019 = vmatmul.mubr.bf16.gmra.mrb[12].mxu0 %v1144_v15 }
  0xa3   : > { %1022 = vmatprep.mubr.bf16.mxu0 %v1145_v16 }
  0xaa   : > { %1023 = vmatmul.mubr.bf16.gmra.mrb[16].mxu0 %v1146_v17 }
  0xab   : > { %1026 = vmatprep.mubr.bf16.mxu0 %v1147_v18 }
  0xb2   : > { %1027 = vmatmul.mubr.bf16.gmra.mrb[20].mxu0 %v1148_v19 }
  0xb3   : > { %1030 = vmatprep.mubr.bf16.mxu0 %v1149_v20 }
  0xba   : > { %1031 = vmatmul.mubr.bf16.gmra.mrb[24].mxu0 %v1150_v21 }
  0xbb   : > { %1034 = vmatprep.mubr.bf16.mxu0 %v1151_v22 }
  0xc2   : > { %1035 = vmatmul.mubr.bf16.gmra.mrb[28].mxu0 %v1152_v23 }
 0x15d   : > { %v1008_v34 = vpop.f32.mrb[0].mxu0 }
 0x15e   : > { %v506_v35 = vpop.f32.mrb[1].mxu0  ;;  %v515_v39 = vadd.f32 %v1008_v34, %v1571_v33 }
 0x15f   : > { %v507_v36 = vadd.f32 %v1571_v33, %v506_v35  ;;  %v1009_v37 = vpop.f32.mrb[2].mxu0 }
 0x160   : > { %v509_v38 = vpop.f32.mrb[3].mxu0  ;;  %v518_v42 = vadd.f32 %v1009_v37, %v1571_v33  ;;  %v635_v44 = vmax.f32 %v515_v39, 0.0 }
 0x161   : > { %v510_v40 = vadd.f32 %v1571_v33, %v509_v38  ;;  %v633_v41 = vmax.f32 %v507_v36, 0.0 }
 0x162   : > { %v636_v48 = vmax.f32 %v518_v42, 0.0 }
 0x163   : > { %v634_v43 = vmax.f32 %v510_v40, 0.0 }
 0x165   : > { %v665_v45 = vadd.f32 %v634_v43, %v633_v41  ;;  %v1012_v46 = vpop.f32.mrb[4].mxu0 }
 0x166   : > { %v522_v47 = vpop.f32.mrb[5].mxu0  ;;  %v531_v53 = vadd.f32 %v1012_v46, %v1571_v33 }
 0x167   : > { %v666_v49 = vadd.f32 %v665_v45, %v635_v44  ;;  %v523_v50 = vadd.f32 %v1571_v33, %v522_v47  ;;  %v1013_v51 = vpop.f32.mrb[6].mxu0 }
 0x168   : > { %v525_v52 = vpop.f32.mrb[7].mxu0  ;;  %v534_v58 = vadd.f32 %v1013_v51, %v1571_v33  ;;  %v639_v60 = vmax.f32 %v531_v53, 0.0 }
 0x169   : > { %v637_v54 = vmax.f32 %v523_v50, 0.0  ;;  %v667_v55 = vadd.f32 %v666_v49, %v636_v48  ;;  %v526_v56 = vadd.f32 %v1571_v33, %v525_v52 }
 0x16a   : > { %v640_v0 = vmax.f32 %v534_v58, 0.0 }
 0x16b   : > { %v668_v57 = vadd.f32 %v667_v55, %v637_v54  ;;  %v638_v59 = vmax.f32 %v526_v56, 0.0 }
 0x16d   : > { %v669_v61 = vadd.f32 %v668_v57, %v638_v59  ;;  %v1016_v62 = vpop.f32.mrb[8].mxu0 }
 0x16e   : > { %v538_v63 = vpop.f32.mrb[9].mxu0  ;;  %v547_v5 = vadd.f32 %v1016_v62, %v1571_v33 }
 0x16f   : > { %v670_v1 = vadd.f32 %v669_v61, %v639_v60  ;;  %v539_v2 = vadd.f32 %v1571_v33, %v538_v63  ;;  %v1017_v3 = vpop.f32.mrb[10].mxu0 }
 0x170   : > { %v541_v4 = vpop.f32.mrb[11].mxu0  ;;  %v550_v10 = vadd.f32 %v1017_v3, %v1571_v33  ;;  %v643_v12 = vmax.f32 %v547_v5, 0.0 }
 0x171   : > { %v641_v6 = vmax.f32 %v539_v2, 0.0  ;;  %v671_v7 = vadd.f32 %v670_v1, %v640_v0  ;;  %v542_v8 = vadd.f32 %v1571_v33, %v541_v4 }
 0x172   : > { %v644_v16 = vmax.f32 %v550_v10, 0.0 }
 0x173   : > { %v672_v9 = vadd.f32 %v671_v7, %v641_v6  ;;  %v642_v11 = vmax.f32 %v542_v8, 0.0 }
 0x175   : > { %v673_v13 = vadd.f32 %v672_v9, %v642_v11  ;;  %v1020_v14 = vpop.f32.mrb[12].mxu0 }
 0x176   : > { %v554_v15 = vpop.f32.mrb[13].mxu0  ;;  %v563_v21 = vadd.f32 %v1020_v14, %v1571_v33 }
 0x177   : > { %v674_v17 = vadd.f32 %v673_v13, %v643_v12  ;;  %v555_v18 = vadd.f32 %v1571_v33, %v554_v15  ;;  %v1021_v19 = vpop.f32.mrb[14].mxu0 }
 0x178   : > { %v557_v20 = vpop.f32.mrb[15].mxu0  ;;  %v566_v26 = vadd.f32 %v1021_v19, %v1571_v33  ;;  %v647_v28 = vmax.f32 %v563_v21, 0.0 }
 0x179   : > { %v645_v22 = vmax.f32 %v555_v18, 0.0  ;;  %v675_v23 = vadd.f32 %v674_v17, %v644_v16  ;;  %v558_v24 = vadd.f32 %v1571_v33, %v557_v20 }
 0x17a   : > { %v648_v32 = vmax.f32 %v566_v26, 0.0 }
 0x17b   : > { %v676_v25 = vadd.f32 %v675_v23, %v645_v22  ;;  %v646_v27 = vmax.f32 %v558_v24, 0.0 }
 0x17d   : > { %v677_v29 = vadd.f32 %v676_v25, %v646_v27  ;;  %v1024_v30 = vpop.f32.mrb[16].mxu0 }
 0x17e   : > { %v570_v31 = vpop.f32.mrb[17].mxu0  ;;  %v579_v38 = vadd.f32 %v1024_v30, %v1571_v33 }
 0x17f   : > { %v678_v34 = vadd.f32 %v677_v29, %v647_v28  ;;  %v571_v35 = vadd.f32 %v1571_v33, %v570_v31  ;;  %v1025_v36 = vpop.f32.mrb[18].mxu0 }
 0x180   : > { %v573_v37 = vpop.f32.mrb[19].mxu0  ;;  %v582_v43 = vadd.f32 %v1025_v36, %v1571_v33  ;;  %v651_v45 = vmax.f32 %v579_v38, 0.0 }
 0x181   : > { %v649_v39 = vmax.f32 %v571_v35, 0.0  ;;  %v679_v40 = vadd.f32 %v678_v34, %v648_v32  ;;  %v574_v41 = vadd.f32 %v1571_v33, %v573_v37 }
 0x182   : > { %v652_v49 = vmax.f32 %v582_v43, 0.0 }
 0x183   : > { %v680_v42 = vadd.f32 %v679_v40, %v649_v39  ;;  %v650_v44 = vmax.f32 %v574_v41, 0.0 }
 0x185   : > { %v681_v46 = vadd.f32 %v680_v42, %v650_v44  ;;  %v1028_v47 = vpop.f32.mrb[20].mxu0 }
 0x186   : > { %v586_v48 = vpop.f32.mrb[21].mxu0  ;;  %v595_v54 = vadd.f32 %v1028_v47, %v1571_v33 }
 0x187   : > { %v682_v50 = vadd.f32 %v681_v46, %v651_v45  ;;  %v587_v51 = vadd.f32 %v1571_v33, %v586_v48  ;;  %v1029_v52 = vpop.f32.mrb[22].mxu0 }
 0x188   : > { %v589_v53 = vpop.f32.mrb[23].mxu0  ;;  %v598_v59 = vadd.f32 %v1029_v52, %v1571_v33  ;;  %v655_v61 = vmax.f32 %v595_v54, 0.0 }
 0x189   : > { %v653_v55 = vmax.f32 %v587_v51, 0.0  ;;  %v683_v56 = vadd.f32 %v682_v50, %v652_v49  ;;  %v590_v57 = vadd.f32 %v1571_v33, %v589_v53 }
 0x18a   : > { %v656_v1 = vmax.f32 %v598_v59, 0.0 }
 0x18b   : > { %v684_v58 = vadd.f32 %v683_v56, %v653_v55  ;;  %v654_v60 = vmax.f32 %v590_v57, 0.0 }
 0x18d   : > { %v685_v62 = vadd.f32 %v684_v58, %v654_v60  ;;  %v1032_v63 = vpop.f32.mrb[24].mxu0 }
 0x18e   : > { %v602_v0 = vpop.f32.mrb[25].mxu0  ;;  %v611_v6 = vadd.f32 %v1032_v63, %v1571_v33 }
 0x18f   : > { %v686_v2 = vadd.f32 %v685_v62, %v655_v61  ;;  %v603_v3 = vadd.f32 %v1571_v33, %v602_v0  ;;  %v1033_v4 = vpop.f32.mrb[26].mxu0 }
 0x190   : > { %v605_v5 = vpop.f32.mrb[27].mxu0  ;;  %v614_v11 = vadd.f32 %v1033_v4, %v1571_v33  ;;  %v659_v13 = vmax.f32 %v611_v6, 0.0 }
 0x191   : > { %v657_v7 = vmax.f32 %v603_v3, 0.0  ;;  %v687_v8 = vadd.f32 %v686_v2, %v656_v1  ;;  %v606_v9 = vadd.f32 %v1571_v33, %v605_v5 }
 0x192   : > { %v660_v17 = vmax.f32 %v614_v11, 0.0 }
 0x193   : > { %v688_v10 = vadd.f32 %v687_v8, %v657_v7  ;;  %v658_v12 = vmax.f32 %v606_v9, 0.0 }
 0x195   : > { %v689_v14 = vadd.f32 %v688_v10, %v658_v12  ;;  %v1036_v15 = vpop.f32.mrb[28].mxu0 }
 0x196   : > { %v618_v16 = vpop.f32.mrb[29].mxu0  ;;  %v627_v22 = vadd.f32 %v1036_v15, %v1571_v33 }
 0x197   : > { %v690_v18 = vadd.f32 %v689_v14, %v659_v13  ;;  %v619_v19 = vadd.f32 %v1571_v33, %v618_v16  ;;  %v1037_v20 = vpop.f32.mrb[30].mxu0 }
 0x198   : > { %v621_v21 = vpop.f32.mrb[31].mxu0  ;;  %v630_v27 = vadd.f32 %v1037_v20, %v1571_v33  ;;  %v663_v29 = vmax.f32 %v627_v22, 0.0 }
 0x199   : > { %v661_v23 = vmax.f32 %v619_v19, 0.0  ;;  %v691_v24 = vadd.f32 %v690_v18, %v660_v17  ;;  %v622_v25 = vadd.f32 %v1571_v33, %v621_v21  ;;  %v720_v33 = vld [vmem:[%s1661_s4] sm:$0x1] }
 0x19a   : > { %v664_v31 = vmax.f32 %v630_v27, 0.0 }
 0x19b   : > { %v692_v26 = vadd.f32 %v691_v24, %v661_v23  ;;  %v662_v28 = vmax.f32 %v622_v25, 0.0 }
 0x19d   : > { %v693_v30 = vadd.f32 %v692_v26, %v662_v28 }
 0x19f   : > { %v694_v32 = vadd.f32 %v693_v30, %v663_v29 }
 0x1a1   : > { %v695_v34 = vadd.f32 %v694_v32, %v664_v31 }
 0x1a3   : > { %v696_v35 = vrot.slane %v695_v34, 4 }
 0x1a5   : > { %v697_v36 = vadd.f32 %v696_v35, %v695_v34 }
 0x1a7   : > { %v698_v37 = vrot.slane %v697_v36, 2 }
 0x1a9   : > { %v699_v38 = vadd.f32 %v698_v37, %v697_v36 }
 0x1ab   : > { %v700_v39 = vrot.slane %v699_v38, 1 }
 0x1ad   : > { %v701_v40 = vadd.f32 %v700_v39, %v699_v38 }
 0x1af   : > { %v702_v41 = vmul.f32 0.00390625, %v701_v40 }
 0x1b1   : > { %v703_v42 = vpack.c.bf16 %v702_v41, %v702_v41 }
 0x1b3   : > { %1055 = vmatmul.mubr.bf16.vlgmr.msra.gmra.mrb[0].mxu1 %v703_v42 }
 0x286   : > { %v803_v43 = vpop.f32.mrb[0].mxu1 }
 0x287   : > { %v804_v44 = vadd.f32 %v803_v43, %v720_v33  ;;  %v1056_v45 = vpop.f32.mrb[1].mxu1 }
 0x288   : > { %v806_v46 = vpop.f32.mrb[2].mxu1 }
 0x289   : > { %809 = vst [vmem:[%s270_s28] sm:$0x1] %v804_v44  ;;  %v1057_v47 = vpop.f32.mrb[3].mxu1 }
 0x28a   : > { %1260 = shalt.err (!%p1257_p1)
}
 0x28b   : > { %s1261_s14 = scalar_lea.hbm %s1613_s11, 16  ;;  %s1265_s26 = scalar_lea.hbm %s1662_s5, 32 }
 0x28c   : > { %p1262_p13 = scmp.ne.s32.totalorder %s1613_s11, %s1261_s14  ;;  %p1266_p4 = scmp.lt.u32.totalorder %s1613_s11, %s1662_s5 }
 0x28d   : > { %p1267_p5 = scmp.lt.u32.totalorder %s1265_s26, %s1261_s14  ;;  %p1269_p11 = scmp.lt.u32.totalorder %s1261_s14, %s1613_s11 }
 0x28e   : > { %p1263_p6 = pnand %p1262_p13, %p1676_p0 }
 0x28f   : > { %p1268_p8 = por %p1267_p5, %p1266_p4 }
 0x290   : > { %p1264_p10 = pneg %p1263_p6 }
 0x291   : > { %p1270_p2 = por %p1269_p11, %p1268_p8 }
 0x293   : > { %p1271_p3 = pnand %p1270_p2, %p1264_p10 }
 0x295   : > { %1274 = shalt.err (!%p1271_p3)
}
 0x296   : > { %1068 = dma.vmem_to_hbm [thread:$0]  (%p1676_p0), %s1615_s12, 16, %s1613_s11, %s811_s17  }
 0x297 PF: > { %s835_s10 = sand.u32 1, %s1305_s18   ;;  %p1677_p7 = scmp.ne.s32.totalorder %s1667_s25, 0 }
 0x298   : > { %p1678_p9 = scmp.ge.s32.totalorder %s1317_s21, 2  ;;  %s836_s28 = scalar_lea.sflag [#allocation4], %s835_s10 }
 0x29a   : > { %p1082_p12 = pnand %p1678_p9, %p1677_p7 }
 0x29c   : > { %1300 = dma.done.wait (!%p1082_p12), %s836_s28, 16  }
 0x29d   : > { %1302 = vsyncadd (!%p1082_p12), %s836_s28, 4294967280  ;;  %p19_p1 = scmp.ge.s32.totalorder %s1473_s29, 4   ;;  %s1679_s18 = smov %s1309_s19 }
 0x29e   : > { %s1680_s19 = smov %s1313_s20  ;;  %s1681_s20 = smov %s1489_s27 }
 0x29f   : > { %s1682_s21 = smov %s1473_s29  ;;  %21 = sbr.rel (!%p19_p1) target bundleno = 6 (0x6), region = 93 }
 0x2a6   :  { %840 = vsyncpa [#allocation3], 1 }
 0x2a7   :  { %842 = vsyncpa [#allocation3 + $0x1], 1 }
 0x2a8   :  { %843 = vsyncpa [#allocation6], 1 }
 0x2a9   :  { %844 = vsyncpa [#allocation4], 1 }
 0x2aa   :  { %846 = vsyncpa [#allocation4 + $0x1], 1 }

</bundles_post_ra>
